<compile_context>
chip_gen: v5e
topology: v5e:2x2
jax: 0.10.0
libtpu: 0.0.40
codegen_flags: <defaults>
</compile_context>

<pallas_src>
import functools

import jax
import jax.numpy as jnp
from jax.experimental import pallas as pl
from jax.experimental.pallas import tpu as pltpu


def _round_up(x, m):
    return (x + m - 1) // m * m


# ----------------- whole-K matmul with fused bias/residual/ReLU --------------

def _mm_kernel(a_ref, b_ref, bias_ref, o_ref, *, apply_relu):
    acc = jnp.dot(a_ref[...], b_ref[...], preferred_element_type=jnp.float32)
    acc = acc + bias_ref[...]
    if apply_relu:
        acc = jnp.maximum(acc, 0.0)
    o_ref[...] = acc.astype(o_ref.dtype)


def _mm_res_kernel(a_ref, b_ref, bias_ref, r_ref, o_ref):
    """Matmul + bias + residual add + ReLU (conv2 of a BasicBlock)."""
    acc = jnp.dot(a_ref[...], b_ref[...], preferred_element_type=jnp.float32)
    acc = acc + bias_ref[...] + r_ref[...].astype(jnp.float32)
    o_ref[...] = jnp.maximum(acc, 0.0).astype(o_ref.dtype)


def pallas_matmul_bias(a, b, bias, *, apply_relu, residual=None,
                       out_dtype=jnp.bfloat16):
    """(M,K)bf16 @ (K,N)bf16 + bias(f32) [+ residual] [+ReLU], f32 accumulate."""
    M, K = a.shape
    Kb, Np = b.shape
    assert K == Kb and Np % 128 == 0
    # TODO(synk): add a K-tiled reduction-axis path for K > 8192 (unused here).
    assert K <= 8192

    # ---- M tiling: take whole when small, 512-tiles otherwise ----
    if M <= 512:
        Mp = _round_up(M, 16)
        tm = Mp
    elif M % 512 == 0:
        Mp, tm = M, 512
    elif M % 256 == 0:
        Mp, tm = M, 256
    else:
        Mp, tm = _round_up(M, 512), 512

    # ---- N tiling: full-N (weight stationary) when it fits comfortably ----
    if Np <= 512:
        tn = Np
    elif Np % 256 == 0:
        tn = 256
    else:
        tn = 128

    # ---- megacore: keep >= 2 parallel blocks so v7x's 2nd TC isn't idle ----
    if (Mp // tm) * (Np // tn) == 1:
        if Mp >= 128 and Mp % 32 == 0:
            tm = Mp // 2
        elif Np % 256 == 0:
            tn = Np // 2

    if Mp != M:
        a = jnp.pad(a, ((0, Mp - M), (0, 0)))
        if residual is not None:
            residual = jnp.pad(residual, ((0, Mp - M), (0, 0)))

    grid = (Mp // tm, Np // tn)
    a_spec = pl.BlockSpec((tm, K), lambda i, j: (i, 0))
    b_spec = pl.BlockSpec((K, tn), lambda i, j: (0, j))
    bias_spec = pl.BlockSpec((1, tn), lambda i, j: (0, j))
    out_spec = pl.BlockSpec((tm, tn), lambda i, j: (i, j))

    # VMEM budget from the actual (double-buffered) tile footprint, clamped so
    # there is always headroom on v7x's 64 MiB VMEM.
    tile_bytes = 2 * (tm * K * 2 + K * tn * 2 + tm * tn * 2 + tn * 4)
    vmem_limit = int(min(48 << 20, max(32 << 20, 2 * tile_bytes)))
    cparams = pltpu.CompilerParams(
        dimension_semantics=("parallel", "parallel"),
        vmem_limit_bytes=vmem_limit,
    )

    if residual is None:
        out = pl.pallas_call(
            functools.partial(_mm_kernel, apply_relu=apply_relu),
            out_shape=jax.ShapeDtypeStruct((Mp, Np), out_dtype),
            grid=grid,
            in_specs=[a_spec, b_spec, bias_spec],
            out_specs=out_spec,
            compiler_params=cparams,
        )(a, b, bias)
    else:
        r_spec = pl.BlockSpec((tm, tn), lambda i, j: (i, j))
        out = pl.pallas_call(
            _mm_res_kernel,
            out_shape=jax.ShapeDtypeStruct((Mp, Np), out_dtype),
            grid=grid,
            in_specs=[a_spec, b_spec, bias_spec, r_spec],
            out_specs=out_spec,
            compiler_params=cparams,
        )(a, b, bias, residual)

    if Mp != M:
        out = out[:M]
    return out


# ------------------------------ max pool 3x3/s2 -----------------------------

def _maxpool_kernel(x_ref, o_ref, *, OH, OW, C):
    # x_ref block: (1, OH+1, 2, OW+1, 2C) -- H/W split into (pair, parity),
    # W parity packed along lanes.  All taps are contiguous static slices.
    v = x_ref[0]                 # (OH+1, 2, OW+1, 2C)
    r0 = v[:, 0]                 # even padded rows: (OH+1, OW+1, 2C)
    r1 = v[:, 1]                 # odd  padded rows

    def wmax(r):
        # cols {2ow, 2ow+1, 2ow+2} of the padded row -> (OH+1, OW, C)
        return jnp.maximum(jnp.maximum(r[:, :OW, :C], r[:, :OW, C:]),
                           r[:, 1:OW + 1, :C])

    w0 = wmax(r0)
    w1 = wmax(r1)
    # rows {2oh, 2oh+1, 2oh+2}  ->  max(w0[oh], w1[oh], w0[oh+1])
    o_ref[0] = jnp.maximum(jnp.maximum(w0[:OH], w1[:OH]), w0[1:OH + 1])


def pallas_maxpool3x3s2(x):
    """MaxPool2d(kernel=3, stride=2, padding=1) on NHWC (C lane-dense)."""
    N, H, W, C = x.shape
    assert H % 2 == 0 and W % 2 == 0 and C % 128 == 0
    OH, OW = H // 2, W // 2
    RH, RW = OH + 1, OW + 1
    xp = jnp.pad(x, ((0, 0), (1, 1), (1, 1), (0, 0)),
                 constant_values=-jnp.inf)
    # Row-major-compatible split of padded H and W into (pair, parity); W
    # parity lands in the lane dim (2C) so all in-kernel taps are contiguous.
    xr = xp.reshape(N, RH, 2, RW, 2 * C)
    return pl.pallas_call(
        functools.partial(_maxpool_kernel, OH=OH, OW=OW, C=C),
        out_shape=jax.ShapeDtypeStruct((N, OH, OW, C), x.dtype),
        grid=(N,),
        in_specs=[pl.BlockSpec((1, RH, 2, RW, 2 * C),
                               lambda n: (n, 0, 0, 0, 0))],
        out_specs=pl.BlockSpec((1, OH, OW, C), lambda n: (n, 0, 0, 0)),
        compiler_params=pltpu.CompilerParams(dimension_semantics=("parallel",)),
    )(xr)


# ------------------------- fused avgpool + final FC -------------------------

def _avgpool_fc_kernel(x_ref, w_ref, b_ref, o_ref):
    feat = jnp.mean(x_ref[...].astype(jnp.float32), axis=1)          # (N, C) f32
    o_ref[...] = (jnp.dot(feat.astype(jnp.bfloat16), w_ref[...],
                          preferred_element_type=jnp.float32) + b_ref[...])


def pallas_avgpool_fc(x, w, b, num_classes):
    N, H, W, C = x.shape
    HW = H * W
    x2 = x.reshape(N, HW, C)
    Npad = _round_up(N, 8)
    if Npad != N:
        x2 = jnp.pad(x2, ((0, Npad - N), (0, 0), (0, 0)))
    ncls_p = w.shape[1]
    out = pl.pallas_call(
        _avgpool_fc_kernel,
        out_shape=jax.ShapeDtypeStruct((Npad, ncls_p), jnp.float32),
        grid=(1,),
        in_specs=[
            pl.BlockSpec((Npad, HW, C), lambda i: (0, 0, 0)),
            pl.BlockSpec((C, ncls_p), lambda i: (0, 0)),
            pl.BlockSpec((1, ncls_p), lambda i: (0, 0)),
        ],
        out_specs=pl.BlockSpec((Npad, ncls_p), lambda i: (0, 0)),
    )(x2, w, b)
    return out[:N, :num_classes]


# --------------------------------- JAX glue ---------------------------------

def im2col(x, kh, kw, stride, pad):
    """NHWC -> (N*OH*OW, KH*KW*Cin) bf16 patches, K ordered (kh, kw, cin)."""
    # TODO(synk): replace with in-kernel tap streaming for larger inputs.
    N, H, W, C = x.shape
    xp = jnp.pad(x, ((0, 0), (pad, pad), (pad, pad), (0, 0))) if pad else x
    OH = (H + 2 * pad - kh) // stride + 1
    OW = (W + 2 * pad - kw) // stride + 1
    cols = []
    for i in range(kh):
        for j in range(kw):
            cols.append(xp[:, i:i + stride * OH:stride, j:j + stride * OW:stride, :])
    patches = jnp.stack(cols, axis=3)                   # (N, OH, OW, KH*KW, C)
    return patches.reshape(N * OH * OW, kh * kw * C), OH, OW


def conv_layer(x, cp, *, relu, residual=None):
    N = x.shape[0]
    patches, OH, OW = im2col(x, cp['k'], cp['k'], cp['stride'], cp['pad'])
    res2 = None
    if residual is not None:
        res2 = residual.reshape(N * OH * OW, residual.shape[-1])
    out = pallas_matmul_bias(patches, cp['w'], cp['b'],
                             apply_relu=relu, residual=res2)
    return out.reshape(N, OH, OW, cp['w'].shape[1])


def basic_block(x, bp):
    out = conv_layer(x, bp['conv1'], relu=True)
    if 'ds' in bp:
        identity = conv_layer(x, bp['ds'], relu=False)
    else:
        identity = x
    # conv2 + BN + residual add + ReLU fused into one matmul epilogue.
    return conv_layer(out, bp['conv2'], relu=True, residual=identity)


def infusenet_forward(x_nchw, pp):
    x = jnp.transpose(x_nchw, (0, 2, 3, 1)).astype(jnp.bfloat16)   # NCHW->NHWC
    x = conv_layer(x, pp['conv1'], relu=True)      # conv1 + bn1 + relu
    x = pallas_maxpool3x3s2(x)                     # maxpool
    for name in ('layer1', 'layer2', 'layer3', 'layer4'):
        for bp in pp[name]:
            x = basic_block(x, bp)
    # NOTE: norm_x_res_layer{1..4} / norm_x_res_avgpool in the PyTorch forward
    # are dead code (unused by the returned value), so they are skipped.
    return pallas_avgpool_fc(x, pp['fc_w'], pp['fc_b'], pp['num_classes'])


# ------------------- one-time parameter folding / padding -------------------

def _fold_conv_bn(w, bn, cin_act, cout_act, stride, pad):
    """Fold eval-mode BN into the conv, pad channels, emit (K,N) bf16 matrix.

    Padded output channels get zero weights and zero bias; combined with the
    ReLU epilogues this keeps padded activation channels exactly 0, which the
    fused residual add relies on.
    """
    gamma, beta, mean, var = bn
    scale = gamma / jnp.sqrt(var + 1e-5)
    w_f = w * scale[:, None, None, None]                 # (Cout, Cin, KH, KW)
    bias = beta - mean * scale
    cout, cin, kh, kw = w.shape
    w_m = jnp.transpose(w_f, (2, 3, 1, 0))               # (KH, KW, Cin, Cout)
    w_m = jnp.pad(w_m, ((0, 0), (0, 0),
                        (0, cin_act - cin), (0, cout_act - cout)))
    w_m = w_m.reshape(kh * kw * cin_act, cout_act).astype(jnp.bfloat16)
    b = jnp.pad(bias, (0, cout_act - cout)).reshape(1, cout_act).astype(jnp.float32)
    return {'w': w_m, 'b': b, 'k': kh, 'stride': stride, 'pad': pad}


def prepare_params(p, num_classes):
    """Hoisted out of the forward path: BN fold, transpose, 128-channel pad, bf16."""
    def cpad(c):
        return max(128, _round_up(c, 128))

    pp = {'conv1': _fold_conv_bn(p['conv1'], p['bn1'], 3, cpad(64), 2, 3)}
    cin_act = cpad(64)
    plan = {'layer1': (64, 1), 'layer2': (128, 2),
            'layer3': (256, 2), 'layer4': (512, 2)}
    for name in ('layer1', 'layer2', 'layer3', 'layer4'):
        cout, stride0 = plan[name]
        cout_act = cpad(cout)
        blocks = []
        for bi, bp in enumerate(p[name]):
            stride = stride0 if bi == 0 else 1
            d = {'conv1': _fold_conv_bn(bp['conv1'], bp['bn1'],
                                        cin_act, cout_act, stride, 1),
                 'conv2': _fold_conv_bn(bp['conv2'], bp['bn2'],
                                        cout_act, cout_act, 1, 1)}
            if 'ds_conv' in bp:
                d['ds'] = _fold_conv_bn(bp['ds_conv'], bp['ds_bn'],
                                        cin_act, cout_act, stride, 0)
            blocks.append(d)
            cin_act = cout_act
        pp[name] = blocks
    ncls_p = cpad(num_classes)
    pp['fc_w'] = jnp.pad(p['fc_w'].T,
                         ((0, 0), (0, ncls_p - num_classes))).astype(jnp.bfloat16)
    pp['fc_b'] = jnp.pad(p['fc_b'],
                         (0, ncls_p - num_classes)).reshape(1, ncls_p).astype(jnp.float32)
    pp['num_classes'] = num_classes
    return pp


# --------------------------- deterministic params ---------------------------

def init_params(key, num_classes):
    keys = iter(jax.random.split(key, 256))

    def conv(cout, cin, k):
        return 0.05 * jax.random.normal(next(keys), (cout, cin, k, k), jnp.float32)

    def bn(c):
        g = 1.0 + 0.1 * jax.random.normal(next(keys), (c,), jnp.float32)
        b = 0.1 * jax.random.normal(next(keys), (c,), jnp.float32)
        m = 0.1 * jax.random.normal(next(keys), (c,), jnp.float32)
        v = 1.0 + 0.1 * jax.random.uniform(next(keys), (c,), jnp.float32)
        return (g, b, m, v)

    def block(cin, cout, stride):
        d = {'conv1': conv(cout, cin, 3), 'bn1': bn(cout),
             'conv2': conv(cout, cout, 3), 'bn2': bn(cout)}
        if stride != 1 or cin != cout:
            d['ds_conv'] = conv(cout, cin, 1)
            d['ds_bn'] = bn(cout)
        return d

    p = {'conv1': conv(64, 3, 7), 'bn1': bn(64)}
    p['layer1'] = [block(64, 64, 1), block(64, 64, 1)]
    p['layer2'] = [block(64, 128, 2), block(128, 128, 1)]
    p['layer3'] = [block(128, 256, 2), block(256, 256, 1)]
    p['layer4'] = [block(256, 512, 2), block(512, 512, 1)]
    p['fc_w'] = 0.05 * jax.random.normal(next(keys), (num_classes, 512), jnp.float32)
    p['fc_b'] = 0.05 * jax.random.normal(next(keys), (num_classes,), jnp.float32)
    return p


if __name__ == "__main__":
    key = jax.random.PRNGKey(0)
    k_in, k_p = jax.random.split(key)
    num_classes = 10
    # Small ImageNet-like input: NCHW, 3 channels, 32x32 spatial.
    x = jax.random.normal(k_in, (2, 3, 32, 32), jnp.float32)
    raw_params = init_params(k_p, num_classes)
    params = prepare_params(raw_params, num_classes)   # hoisted (done once)
    out = infusenet_forward(x, params)
    jax.block_until_ready(out)
    assert out.shape == (2, num_classes)
    print("KERNEL_OK")
</pallas_src>

<mosaic_0001>
module attributes {stable_mosaic.version = 11 : i64} {
  func.func @_mm_kernel(%arg0: i32, %arg1: i32, %arg2: memref<256x147xbf16, #tpu.memory_space<vmem>>, %arg3: memref<147x128xbf16, #tpu.memory_space<vmem>>, %arg4: memref<1x128xf32, #tpu.memory_space<vmem>>, %arg5: memref<256x128xbf16, #tpu.memory_space<vmem>>) attributes {dimension_semantics = [#tpu.dimension_semantics<parallel>, #tpu.dimension_semantics<parallel>], iteration_bounds = array<i64: 2, 1>, scalar_prefetch = 0 : i64, scratch_operands = 0 : i64, tpu.core_type = #tpu.core_type<tc>, window_params = [{transform_indices = @transform_0, window_bounds = array<i64: 256, 147>}, {transform_indices = @transform_1, window_bounds = array<i64: 147, 128>}, {transform_indices = @transform_2, window_bounds = array<i64: 1, 128>}, {transform_indices = @transform_3, window_bounds = array<i64: 256, 128>}]} {
    %c0 = arith.constant 0 : index
    %c0_0 = arith.constant 0 : index
    %0 = vector.load %arg2[%c0, %c0_0] : memref<256x147xbf16, #tpu.memory_space<vmem>>, vector<256x147xbf16>
    %c0_1 = arith.constant 0 : index
    %c0_2 = arith.constant 0 : index
    %1 = vector.load %arg3[%c0_1, %c0_2] : memref<147x128xbf16, #tpu.memory_space<vmem>>, vector<147x128xbf16>
    %cst = arith.constant dense<0.000000e+00> : vector<256x128xf32>
    %2 = tpu.matmul %0, %1, %cst {dimension_numbers = #tpu.dot_dimension_numbers<[1], [0], [0], [1], [0, 0, 1, 1], [], []>} : vector<256x147xbf16>, vector<147x128xbf16>, vector<256x128xf32> -> vector<256x128xf32>
    %c0_3 = arith.constant 0 : index
    %c0_4 = arith.constant 0 : index
    %3 = vector.load %arg4[%c0_3, %c0_4] : memref<1x128xf32, #tpu.memory_space<vmem>>, vector<1x128xf32>
    %4 = vector.broadcast %3 : vector<1x128xf32> to vector<256x128xf32>
    %5 = arith.addf %2, %4 : vector<256x128xf32>
    %cst_5 = arith.constant 0.000000e+00 : f32
    %6 = vector.broadcast %cst_5 : f32 to vector<256x128xf32>
    %7 = arith.maximumf %5, %6 : vector<256x128xf32>
    %8 = arith.truncf %7 : vector<256x128xf32> to vector<256x128xbf16>
    %c0_6 = arith.constant 0 : index
    %c0_7 = arith.constant 0 : index
    %9 = vector.load %arg5[%c0_6, %c0_7] : memref<256x128xbf16, #tpu.memory_space<vmem>>, vector<256x128xbf16>
    tpu.vector_store %arg5[%c0_6, %c0_7], %8 {strides = array<i32>} : memref<256x128xbf16, #tpu.memory_space<vmem>>, vector<256x128xbf16>,
    return
  }
  func.func @transform_0(%arg0: i32, %arg1: i32) -> (i32, i32) {
    %c0_i32 = arith.constant 0 : i32
    %c0_i32_0 = arith.constant 0 : i32
    return %arg0, %c0_i32 : i32, i32
  }
  func.func @transform_1(%arg0: i32, %arg1: i32) -> (i32, i32) {
    %c0_i32 = arith.constant 0 : i32
    %c0_i32_0 = arith.constant 0 : i32
    return %c0_i32, %arg1 : i32, i32
  }
  func.func @transform_2(%arg0: i32, %arg1: i32) -> (i32, i32) {
    %c0_i32 = arith.constant 0 : i32
    %c0_i32_0 = arith.constant 0 : i32
    return %c0_i32, %arg1 : i32, i32
  }
  func.func @transform_3(%arg0: i32, %arg1: i32) -> (i32, i32) {
    %c0_i32 = arith.constant 0 : i32
    return %arg0, %arg1 : i32, i32
  }
}

</mosaic_0001>

<bundles_post_ra>
// kernel: tpu_custom_call.1
= control target key start
LH: loop header
LB: loop body
LE: loop exit
PB: predicated region body
PF: predicated region fallthrough
CT: control target
= control target key end

     0   :  { %8 = vsyncpa [#allocation3], 0  ;;  %s1703_s0 = inlined_call_operand.vmem [shape: bf16[512,147], index: 0, kind: input, shape index: {}]   ;;  %s1704_s1 = inlined_call_operand.vmem [shape: bf16[147,128], index: 1, kind: input, shape index: {}]   ;;  %s1705_s2 = inlined_call_operand.vmem [shape: f32[1,128], index: 2, kind: input, shape index: {}]   ;;  %s1706_s3 = inlined_call_operand.hbm [shape: bf16[512,128], index: 3, kind: output, shape index: {}]  }
   0x1   :  { %10 = vsyncpa [#allocation3 + $0x1], 0  ;;  %s1429_s12 = smov 0   ;;  %s1431_s13 = smov 0  }
   0x2   :  { %s1433_s14 = smov 0   ;;  %s1435_s15 = smov 0  }
   0x3   :  { %s1437_s16 = smov 0   ;;  %s1439_s17 = smov 0  }
   0x4 LB: > { %s923_s18 = sadd.s32 4294967295, %s1404_s17   ;;  %s924_s19 = sadd.s32 4294967294, %s1404_s17   ;;  %s1404_s17 = sphi %s1439_s17, %s16_s17   ;;  %s1400_s16 = sphi %s1437_s16, %s1713_s16   ;;  %s1396_s15 = sphi %s1435_s15, %s1712_s15   ;;  %s1392_s14 = sphi %s1433_s14, %s1711_s14   ;;  %s1388_s13 = sphi %s1431_s13, %s1710_s13   ;;  %s1384_s12 = sphi %s1429_s12, %s1709_s12  }
   0x5   : > { %s28_s20 = sadd.s32 1, %s1400_s16  ;;  %s115_s21 = sadd.s32 1, %s1392_s14 }
   0x6   : > { %p30_p0 = scmp.ge.s32.totalorder %s28_s20, 2  ;;  %p125_p1 = scmp.ne.s32.totalorder %s1392_s14, %s1388_s13 }
   0x7   : > { %p126_p2 = scmp.eq.s32.totalorder %s923_s18, 1  ;;  %p131_p3 = scmp.ne.s32.totalorder %s1388_s13, %s1384_s12 }
   0x8   : > { %s1715_s20 = smov (%p30_p0, %s28_s20), 0  ;;  %p132_p5 = scmp.eq.s32.totalorder %s924_s19, 1 }
   0x9   : > { %p1469_p4 = por %p126_p2, %p125_p1  ;;  %s110_s23 = ssub.s32 %s1400_s16, %s1715_s20 }
   0xa   : > { %p929_p6 = scmp.ge.s32.totalorder %s1404_s17, 1  ;;  %p113_p7 = scmp.eq.s32.totalorder %s110_s23, 0 }
   0xb   : > { %p1476_p8 = por %p132_p5, %p131_p3  ;;  %p173_p9 = scmp.lt.s32.totalorder %s1404_s17, 3 }
   0xc   : > { %s1482_s25 = scalar_select %p113_p7, %s1392_s14, %s115_s21  }
   0xd   : > { %p174_p10 = pnand %p929_p6, %p173_p9 }
   0xe   : > { %s931_s30 = sshll.u32 (!%p174_p10), %s1396_s15, 5  ;;  %s202_s9 = sand.u32 (!%p174_p10), 1, %s1388_s13  }
   0xf   : > { %177 = sbr.rel (%p174_p10) target bundleno = 316 (0x13c), region = 32  ;;  %p206_p11 = scmp.lt.s32.totalorder (!%p174_p10), %s931_s30, 63 }
  0x10   : > { %s930_s10 = sshll.u32 (!%p174_p10), %s202_s9, 7  ;;  %s1161_s18 = sshll.u32 (!%p174_p10), %s1396_s15, 7 }
  0x11   : > { %s1614_s11 = scalar_lea.vmem (!%p174_p10), [#allocation2], %s930_s10  ;;  %s820_s23 = scalar_lea.hbm (!%p174_p10), %s1706_s3, %s1161_s18 }
  0x12   : > { %s821_s26 = sshll.u32 (!%p174_p10), %s1614_s11, 4  ;;  %s823_s27 = sshll.u32 (!%p174_p10), %s820_s23, 4  ;;  %s822_s26 = int_to_ptr.vmem [resolvable:$true] %s821_s26  ;;  %s824_s27 = int_to_ptr.hbm [resolvable:$true] %s823_s27 }
  0x13   : > { %s808_s15 = scalar_lea.sflag (!%p174_p10), [#allocation3], %s202_s9  ;;  %s1340_s28 = sshra.s32 (!%p174_p10), %s824_s27, 4  ;;  %s1341_s28 = int_to_ptr.hbm [resolvable:$true] %s1340_s28 }
  0x14   : > { %v1159_v0 = vld [vmem:[%s1704_s1 + $0x38] sm:$0xff]  ;;  %v271_v1 = vld [vmem:[%s1704_s1 + $0x48] sm:$0x3]  ;;  %vm526_vm0 = vcmask 1040384   ;;  %vm527_vm1 = vcmask 1041408   ;;  %v1158_v3 = vld [vmem:[%s1704_s1 + $0x30] sm:$0xff]  ;;  %p1347_p1 = scmp.lt.s32.totalorder %s1341_s28, %s1706_s3 }
  0x15   : > { %v457_v2 = vunpack.c.l.b16 %v271_v1  ;;  %533 = vmatpush.bf16.msra.mxu0 %v1159_v0  ;;  %1257 = vmatpush.bf16.msra.mxu2 %v1159_v0  ;;  %v1406_v4 = vmov 65535   ;;  %s1717_s30 = smov (!%p206_p11, %s931_s30), 63  ;;  %v1157_v9 = vld [vmem:[%s1704_s1 + $0x28] sm:$0xff]  ;;  %v1160_v10 = vld [vmem:[%s1704_s1 + $0x40] sm:$0xff]  ;;  %vm477_vm2 = vcmask 154624   ;;  %v1155_v18 = vld [vmem:[%s1704_s1 + $0x18] sm:$0xff] }
  0x16   : > { %v528_v5 = vsel %vm526_vm0, 4294967295, %v1406_v4  ;;  %s1119_s8 = sshll.u32 %s1717_s30, 3  ;;  %v1156_v14 = vld [vmem:[%s1704_s1 + $0x20] sm:$0xff]  ;;  %v1154_v19 = vld [vmem:[%s1704_s1 + $0x10] sm:$0xff]  ;;  %v1153_v20 = vld [vmem:[%s1704_s1 + $0x8] sm:$0xff]  ;;  %s1342_s29 = scalar_lea.hbm %s1341_s28, 128 }
  0x17   : > { %v467_v6 = vpack.c.b16 %v457_v2, %v457_v2  ;;  %v529_v7 = vsel %vm527_vm1, %v528_v5, 0  ;;  %s1503_s19 = scalar_lea.vmem %s1703_s0, %s1119_s8  ;;  %v1152_v26 = vld [vmem:[%s1704_s1] sm:$0xff]  ;;  %p1343_p12 = scmp.ne.s32.totalorder %s1341_s28, %s1342_s29 }
  0x18   : > { %v1120_v11 = vld [vmem:[%s1503_s19 + $0x4] sm:$0xf]  ;;  %v938_v12 = vld [vmem:[%s1503_s19 + $0x8] sm:$0xf0]  ;;  %v1138_v15 = vld [vmem:[%s1503_s19 + $0x94] sm:$0xf] }
  0x19   : > { %v531_v8 = vand.u32 %v529_v7, %v467_v6  ;;  %534 = vmatpush.bf16.msra.mxu0 %v1158_v3  ;;  %1258 = vmatpush.bf16.msra.mxu2 %v1158_v3  ;;  %v941_v13 = vor.u32 %v1120_v11, %v938_v12  ;;  %v1010_v16 = vld [vmem:[%s1503_s19 + $0x98] sm:$0xf0]  ;;  %v1122_v21 = vld [vmem:[%s1503_s19 + $0x14] sm:$0xf]  ;;  %v1140_v23 = vld [vmem:[%s1503_s19 + $0xa4] sm:$0xf]  ;;  %p1344_p13 = pnand %p1343_p12, %p1469_p4 }
  0x1a   : > { %v1013_v17 = vor.u32 %v1138_v15, %v1010_v16  ;;  %v946_v22 = vld [vmem:[%s1503_s19 + $0x18] sm:$0xf0]  ;;  %v1018_v24 = vld [vmem:[%s1503_s19 + $0xa8] sm:$0xf0]  ;;  %v936_v27 = vld [vmem:[%s1503_s19] sm:$0xf] }
  0x1b   : > { %628 = vmatpush.bf16.msra.mxu1 %v531_v8  ;;  %1265 = vmatpush.bf16.msra.mxu3 %v531_v8  ;;  %v949_v25 = vor.u32 %v1122_v21, %v946_v22  ;;  %v1121_v28 = vld [vmem:[%s1503_s19 + $0x4] sm:$0xf0]  ;;  %v1000_v29 = vld [vmem:[%s1503_s19 + $0x80] sm:$0xf]  ;;  %v1021_v31 = vor.u32 %v1140_v23, %v1018_v24  ;;  %v1124_v34 = vld [vmem:[%s1503_s19 + $0x24] sm:$0xf]  ;;  %p1345_p0 = pneg %p1344_p13 }
  0x1c   : > { %v1137_v30 = vld [vmem:[%s1503_s19 + $0x84] sm:$0xf0]  ;;  %v937_v32 = vor.u32 %v1121_v28, %v936_v27  ;;  %v954_v35 = vld [vmem:[%s1503_s19 + $0x28] sm:$0xf0]  ;;  %v1142_v36 = vld [vmem:[%s1503_s19 + $0xb4] sm:$0xf] }
  0x1d   : > { %535 = vmatpush.bf16.msra.mxu0 %v1157_v9  ;;  %1259 = vmatpush.bf16.msra.mxu2 %v1157_v9  ;;  %v1001_v33 = vor.u32 %v1137_v30, %v1000_v29  ;;  %v1026_v37 = vld [vmem:[%s1503_s19 + $0xb8] sm:$0xf0]  ;;  %v957_v38 = vor.u32 %v1124_v34, %v954_v35  ;;  %v944_v39 = vld [vmem:[%s1503_s19 + $0x10] sm:$0xf]  ;;  %v1123_v40 = vld [vmem:[%s1503_s19 + $0x14] sm:$0xf0] }
  0x1e   : > { %v1008_v41 = vld [vmem:[%s1503_s19 + $0x90] sm:$0xf]  ;;  %v1139_v42 = vld [vmem:[%s1503_s19 + $0x94] sm:$0xf0]  ;;  %v1029_v43 = vor.u32 %v1142_v36, %v1026_v37  ;;  %v945_v44 = vor.u32 %v1123_v40, %v944_v39  ;;  %v1126_v46 = vld [vmem:[%s1503_s19 + $0x34] sm:$0xf] }
  0x1f   : > { %629 = vmatpush.bf16.msra.mxu1 %v1160_v10  ;;  %1266 = vmatpush.bf16.msra.mxu3 %v1160_v10  ;;  %v1009_v45 = vor.u32 %v1139_v42, %v1008_v41  ;;  %v962_v47 = vld [vmem:[%s1503_s19 + $0x38] sm:$0xf0]  ;;  %v1144_v48 = vld [vmem:[%s1503_s19 + $0xc4] sm:$0xf]  ;;  %v1034_v49 = vld [vmem:[%s1503_s19 + $0xc8] sm:$0xf0] }
  0x20   : > { %v965_v50 = vor.u32 %v1126_v46, %v962_v47  ;;  %v952_v51 = vld [vmem:[%s1503_s19 + $0x20] sm:$0xf]  ;;  %v1125_v52 = vld [vmem:[%s1503_s19 + $0x24] sm:$0xf0]  ;;  %v1037_v55 = vor.u32 %v1144_v48, %v1034_v49  ;;  %v1128_v58 = vld [vmem:[%s1503_s19 + $0x44] sm:$0xf] }
  0x21   : > { %536 = vmatpush.bf16.msra.mxu0 %v1156_v14  ;;  %1260 = vmatpush.bf16.msra.mxu2 %v1156_v14  ;;  %v1016_v53 = vld [vmem:[%s1503_s19 + $0xa0] sm:$0xf]  ;;  %v1141_v54 = vld [vmem:[%s1503_s19 + $0xa4] sm:$0xf0]  ;;  %v953_v56 = vor.u32 %v1125_v52, %v952_v51  ;;  %v970_v59 = vld [vmem:[%s1503_s19 + $0x48] sm:$0xf0] }
  0x22   : > { %1098 = vmatmul.msk.bf16.vlgmr.msra.gmra.mxu1 %vm477_vm2, %v941_v13  ;;  %1107 = vmatmul.msk.bf16.vlgmr.msra.gmra.mxu3 %vm477_vm2, %v1013_v17  ;;  %v1017_v57 = vor.u32 %v1141_v54, %v1016_v53  ;;  %v1146_v60 = vld [vmem:[%s1503_s19 + $0xd4] sm:$0xf]  ;;  %v1042_v61 = vld [vmem:[%s1503_s19 + $0xd8] sm:$0xf0]  ;;  %v973_v62 = vor.u32 %v1128_v58, %v970_v59  ;;  %v960_v63 = vld [vmem:[%s1503_s19 + $0x30] sm:$0xf] }
  0x23   : > { %v1127_v0 = vld [vmem:[%s1503_s19 + $0x34] sm:$0xf0]  ;;  %v1024_v1 = vld [vmem:[%s1503_s19 + $0xb0] sm:$0xf]  ;;  %v1045_v3 = vor.u32 %v1146_v60, %v1042_v61  ;;  %v1130_v6 = vld [vmem:[%s1503_s19 + $0x54] sm:$0xf] }
  0x24   : > { %v1143_v2 = vld [vmem:[%s1503_s19 + $0xb4] sm:$0xf0]  ;;  %v961_v4 = vor.u32 %v1127_v0, %v960_v63  ;;  %v978_v7 = vld [vmem:[%s1503_s19 + $0x58] sm:$0xf0]  ;;  %v1148_v8 = vld [vmem:[%s1503_s19 + $0xe4] sm:$0xf] }
  0x25   : > { %537 = vmatpush.bf16.msra.mxu0 %v1155_v18  ;;  %1261 = vmatpush.bf16.msra.mxu2 %v1155_v18  ;;  %v1025_v5 = vor.u32 %v1143_v2, %v1024_v1  ;;  %v1050_v9 = vld [vmem:[%s1503_s19 + $0xe8] sm:$0xf0]  ;;  %v981_v10 = vor.u32 %v1130_v6, %v978_v7  ;;  %v968_v11 = vld [vmem:[%s1503_s19 + $0x40] sm:$0xf]  ;;  %v1129_v12 = vld [vmem:[%s1503_s19 + $0x44] sm:$0xf0] }
  0x26   : > { %v1032_v13 = vld [vmem:[%s1503_s19 + $0xc0] sm:$0xf]  ;;  %v1145_v14 = vld [vmem:[%s1503_s19 + $0xc4] sm:$0xf0]  ;;  %v1053_v15 = vor.u32 %v1148_v8, %v1050_v9  ;;  %v969_v16 = vor.u32 %v1129_v12, %v968_v11  ;;  %v1132_v18 = vld [vmem:[%s1503_s19 + $0x64] sm:$0xf] }
  0x27   : > { %v1033_v17 = vor.u32 %v1145_v14, %v1032_v13  ;;  %v1058_v21 = vld [vmem:[%s1503_s19 + $0xf8] sm:$0xf0]  ;;  %v976_v23 = vld [vmem:[%s1503_s19 + $0x50] sm:$0xf]  ;;  %v1131_v24 = vld [vmem:[%s1503_s19 + $0x54] sm:$0xf0] }
  0x28   : > { %v977_v28 = vor.u32 %v1131_v24, %v976_v23  ;;  %v1134_v30 = vld [vmem:[%s1503_s19 + $0x74] sm:$0xf]  ;;  %v1133_v34 = vld [vmem:[%s1503_s19 + $0x64] sm:$0xf0]  ;;  %v1048_v35 = vld [vmem:[%s1503_s19 + $0xe0] sm:$0xf] }
  0x29   : > { %538 = vmatpush.bf16.msra.mxu0 %v1154_v19  ;;  %1262 = vmatpush.bf16.msra.mxu2 %v1154_v19  ;;  %v986_v19 = vld [vmem:[%s1503_s19 + $0x68] sm:$0xf0]  ;;  %v1149_v36 = vld [vmem:[%s1503_s19 + $0xe4] sm:$0xf0]  ;;  %v1136_v39 = vld [vmem:[%s1503_s19 + $0x84] sm:$0xf] }
  0x2a   : > { %v989_v22 = vor.u32 %v1132_v18, %v986_v19  ;;  %v1002_v40 = vld [vmem:[%s1503_s19 + $0x88] sm:$0xf0]  ;;  %v992_v42 = vld [vmem:[%s1503_s19 + $0x70] sm:$0xf]  ;;  %v1151_v46 = vld [vmem:[%s1503_s19 + $0xf4] sm:$0xf0] }
  0x2b   : > { %v1005_v41 = vor.u32 %v1136_v39, %v1002_v40  ;;  %v1603_v53 = vld [vmem:[%s1705_s2] ss:$0 sm:$0xff]  ;;  %s1346_s5 = scalar_lea.hbm %s1706_s3, 256 }
  0x2c   : > { %p1348_p2 = scmp.lt.s32.totalorder %s1346_s5, %s1342_s29 }
  0x2d   : > { %539 = vmatpush.bf16.msra.mxu0 %v1153_v20  ;;  %1263 = vmatpush.bf16.msra.mxu2 %v1153_v20  ;;  %v1150_v20 = vld [vmem:[%s1503_s19 + $0xf4] sm:$0xf] }
  0x2e   : > { %v1061_v27 = vor.u32 %v1150_v20, %v1058_v21  ;;  %p1349_p3 = por %p1348_p2, %p1347_p1 }
  0x30   : > { %p1350_p5 = pnand %p1349_p3, %p1345_p0 }
  0x31   : > { %540 = vmatpush.bf16.msra.mxu0 %v1152_v26  ;;  %1264 = vmatpush.bf16.msra.mxu2 %v1152_v26  ;;  %v1147_v26 = vld [vmem:[%s1503_s19 + $0xd4] sm:$0xf0] }
  0x32   : > { %1099 = vmatmul.msk.bf16.gmra.mxu1 %vm477_vm2, %v949_v25  ;;  %1108 = vmatmul.msk.bf16.gmra.mxu3 %vm477_vm2, %v1021_v31  ;;  %v1040_v25 = vld [vmem:[%s1503_s19 + $0xd0] sm:$0xf]  ;;  %v994_v31 = vld [vmem:[%s1503_s19 + $0x78] sm:$0xf0] }
  0x33   : > { %v1041_v29 = vor.u32 %v1147_v26, %v1040_v25 }
  0x34   : > { %541 = vmatmul.bf16.vlgmr.msra.gmra.mxu0 %v937_v32  ;;  %581 = vmatmul.bf16.vlgmr.msra.gmra.mxu2 %v1001_v33  ;;  %v997_v32 = vor.u32 %v1134_v30, %v994_v31  ;;  %v984_v33 = vld [vmem:[%s1503_s19 + $0x60] sm:$0xf] }
  0x35   : > { %v985_v37 = vor.u32 %v1133_v34, %v984_v33 }
  0x42   : > { %1100 = vmatmul.msk.bf16.gmra.mxu1 %vm477_vm2, %v957_v38  ;;  %1109 = vmatmul.msk.bf16.gmra.mxu3 %vm477_vm2, %v1029_v43  ;;  %v1049_v38 = vor.u32 %v1149_v36, %v1048_v35  ;;  %v1135_v43 = vld [vmem:[%s1503_s19 + $0x74] sm:$0xf0] }
  0x43   : > { %v993_v47 = vor.u32 %v1135_v43, %v992_v42 }
  0x44   : > { %546 = vmatmul.bf16.gmra.mxu0 %v945_v44  ;;  %586 = vmatmul.bf16.gmra.mxu2 %v1009_v45  ;;  %v1056_v45 = vld [vmem:[%s1503_s19 + $0xf0] sm:$0xf] }
  0x45   : > { %v1057_v48 = vor.u32 %v1151_v46, %v1056_v45 }
  0x52   : > { %1101 = vmatmul.msk.bf16.gmra.mxu1 %vm477_vm2, %v965_v50  ;;  %1110 = vmatmul.msk.bf16.gmra.mxu3 %vm477_vm2, %v1037_v55 }
  0x54   : > { %551 = vmatmul.bf16.gmra.mxu0 %v953_v56  ;;  %591 = vmatmul.bf16.gmra.mxu2 %v1017_v57 }
  0x62   : > { %1102 = vmatmul.msk.bf16.gmra.mxu1 %vm477_vm2, %v973_v62  ;;  %1111 = vmatmul.msk.bf16.gmra.mxu3 %vm477_vm2, %v1045_v3 }
  0x64   : > { %556 = vmatmul.bf16.gmra.mxu0 %v961_v4  ;;  %596 = vmatmul.bf16.gmra.mxu2 %v1025_v5 }
  0x72   : > { %1103 = vmatmul.msk.bf16.gmra.mxu1 %vm477_vm2, %v981_v10  ;;  %1112 = vmatmul.msk.bf16.gmra.mxu3 %vm477_vm2, %v1053_v15 }
  0x74   : > { %561 = vmatmul.bf16.gmra.mxu0 %v969_v16  ;;  %601 = vmatmul.bf16.gmra.mxu2 %v1033_v17 }
  0x82   : > { %1104 = vmatmul.msk.bf16.gmra.mxu1 %vm477_vm2, %v989_v22  ;;  %1113 = vmatmul.msk.bf16.gmra.mxu3 %vm477_vm2, %v1061_v27 }
  0x84   : > { %566 = vmatmul.bf16.gmra.mxu0 %v977_v28  ;;  %606 = vmatmul.bf16.gmra.mxu2 %v1041_v29 }
  0x92   : > { %1105 = vmatmul.msk.bf16.gmra.mxu1 %vm477_vm2, %v997_v32 }
  0x94   : > { %571 = vmatmul.bf16.gmra.mxu0 %v985_v37  ;;  %611 = vmatmul.bf16.gmra.mxu2 %v1049_v38 }
  0x9f   : > { %v631_v44 = vpop.f32.mrf.mxu1 }
  0xa2   : > { %1106 = vmatmul.msk.bf16.gmra.mxu1 %vm477_vm2, %v1005_v41 }
  0xa4   : > { %576 = vmatmul.bf16.gmra.mxu0 %v993_v47  ;;  %616 = vmatmul.bf16.gmra.mxu2 %v1057_v48 }
  0xa5   : > { %v676_v51 = vpop.f32.mrf.mxu3 }
  0xa7   : > { %v633_v49 = vpop.f32.mrf.mxu1 }
  0xad   : > { %v678_v60 = vpop.f32.mrf.mxu3 }
  0xaf   : > { %v636_v50 = vpop.f32.mrf.mxu1 }
  0xb1   : > { %v542_v52 = vpop.f32.mrf.mxu0 }
  0xb2   : > { %v543_v54 = vadd.f32 %v1603_v53, %v542_v52 }
  0xb4   : > { %v632_v58 = vadd.f32 %v631_v44, %v543_v54 }
  0xb5   : > { %v681_v4 = vpop.f32.mrf.mxu3 }
  0xb6   : > { %v711_v62 = vmax.f32 %v632_v58, 0.0 }
  0xb7   : > { %v638_v55 = vpop.f32.mrf.mxu1  ;;  %v1606_v56 = vpop.f32.mrf.mxu2 }
  0xb9   : > { %v544_v57 = vpop.f32.mrf.mxu0 }
  0xba   : > { %v545_v59 = vadd.f32 %v1603_v53, %v544_v57 }
  0xbc   : > { %v634_v61 = vadd.f32 %v633_v49, %v545_v59 }
  0xbd   : > { %v683_v16 = vpop.f32.mrf.mxu3 }
  0xbe   : > { %v712_v63 = vmax.f32 %v634_v61, 0.0 }
  0xbf   : > { %v641_v0 = vpop.f32.mrf.mxu1  ;;  %v1612_v2 = vpop.f32.mrf.mxu2 }
  0xc0   : > { %v1165_v1 = vpack.c.bf16 %v712_v63, %v711_v62 }
  0xc1   : > { %v547_v3 = vpop.f32.mrf.mxu0 }
  0xc2   : > { %1166 = vst [vmem:[%s1614_s11] sm:$0xff] %v1165_v1   ;;  %v548_v5 = vadd.f32 %v1603_v53, %v547_v3 }
  0xc4   : > { %v637_v9 = vadd.f32 %v636_v50, %v548_v5 }
  0xc5   : > { %v686_v29 = vpop.f32.mrf.mxu3 }
  0xc6   : > { %v713_v13 = vmax.f32 %v637_v9, 0.0 }
  0xc7   : > { %v643_v6 = vpop.f32.mrf.mxu1  ;;  %v587_v7 = vpop.f32.mrf.mxu2 }
  0xc8   : > { %v588_v12 = vadd.f32 %v1603_v53, %v587_v7 }
  0xc9   : > { %v549_v8 = vpop.f32.mrf.mxu0 }
  0xca   : > { %v550_v10 = vadd.f32 %v1603_v53, %v549_v8  ;;  %v677_v19 = vadd.f32 %v676_v51, %v588_v12 }
  0xcc   : > { %v639_v11 = vadd.f32 %v638_v55, %v550_v10  ;;  %v729_v23 = vmax.f32 %v677_v19, 0.0 }
  0xcd   : > { %v688_v43 = vpop.f32.mrf.mxu3 }
  0xce   : > { %v714_v14 = vmax.f32 %v639_v11, 0.0 }
  0xcf   : > { %v646_v15 = vpop.f32.mrf.mxu1  ;;  %v589_v18 = vpop.f32.mrf.mxu2 }
  0xd0   : > { %v1170_v17 = vpack.c.bf16 %v714_v14, %v713_v13  ;;  %v590_v20 = vadd.f32 %v1603_v53, %v589_v18 }
  0xd1   : > { %v552_v21 = vpop.f32.mrf.mxu0 }
  0xd2   : > { %1242 = vst [vmem:[%s1614_s11 + $0x8] sm:$0xff] %v1170_v17   ;;  %v679_v22 = vadd.f32 %v678_v60, %v590_v20  ;;  %v553_v25 = vadd.f32 %v1603_v53, %v552_v21 }
  0xd4   : > { %v730_v24 = vmax.f32 %v679_v22, 0.0  ;;  %v642_v31 = vadd.f32 %v641_v0, %v553_v25 }
  0xd5   : > { %v691_v57 = vpop.f32.mrf.mxu3 }
  0xd6   : > { %v1210_v27 = vpack.c.bf16 %v730_v24, %v729_v23  ;;  %v715_v35 = vmax.f32 %v642_v31, 0.0 }
  0xd7   : > { %v648_v26 = vpop.f32.mrf.mxu1  ;;  %v592_v28 = vpop.f32.mrf.mxu2 }
  0xd8   : > { %1250 = vst [vmem:[%s1614_s11 + $0x48] sm:$0xff] %v1210_v27   ;;  %v593_v34 = vadd.f32 %v1603_v53, %v592_v28 }
  0xd9   : > { %v554_v30 = vpop.f32.mrf.mxu0 }
  0xda   : > { %v555_v32 = vadd.f32 %v1603_v53, %v554_v30  ;;  %v682_v40 = vadd.f32 %v681_v4, %v593_v34 }
  0xdc   : > { %v644_v33 = vadd.f32 %v643_v6, %v555_v32  ;;  %v731_v45 = vmax.f32 %v682_v40, 0.0 }
  0xdd   : > { %v693_v9 = vpop.f32.mrf.mxu3 }
  0xde   : > { %v716_v36 = vmax.f32 %v644_v33, 0.0 }
  0xdf   : > { %v651_v37 = vpop.f32.mrf.mxu1  ;;  %v594_v39 = vpop.f32.mrf.mxu2 }
  0xe0   : > { %v1175_v38 = vpack.c.bf16 %v716_v36, %v715_v35  ;;  %v595_v41 = vadd.f32 %v1603_v53, %v594_v39 }
  0xe1   : > { %v557_v42 = vpop.f32.mrf.mxu0 }
  0xe2   : > { %1243 = vst [vmem:[%s1614_s11 + $0x10] sm:$0xff] %v1175_v38   ;;  %v684_v44 = vadd.f32 %v683_v16, %v595_v41  ;;  %v558_v47 = vadd.f32 %v1603_v53, %v557_v42 }
  0xe4   : > { %v732_v46 = vmax.f32 %v684_v44, 0.0  ;;  %v647_v52 = vadd.f32 %v646_v15, %v558_v47 }
  0xe5   : > { %v696_v22 = vpop.f32.mrf.mxu3 }
  0xe6   : > { %v1215_v49 = vpack.c.bf16 %v732_v46, %v731_v45  ;;  %v717_v59 = vmax.f32 %v647_v52, 0.0 }
  0xe7   : > { %v653_v48 = vpop.f32.mrf.mxu1  ;;  %v597_v50 = vpop.f32.mrf.mxu2 }
  0xe8   : > { %1251 = vst [vmem:[%s1614_s11 + $0x50] sm:$0xff] %v1215_v49   ;;  %v598_v58 = vadd.f32 %v1603_v53, %v597_v50 }
  0xe9   : > { %v559_v51 = vpop.f32.mrf.mxu0 }
  0xea   : > { %v560_v54 = vadd.f32 %v1603_v53, %v559_v51  ;;  %v687_v0 = vadd.f32 %v686_v29, %v598_v58 }
  0xec   : > { %v649_v55 = vadd.f32 %v648_v26, %v560_v54  ;;  %v733_v5 = vmax.f32 %v687_v0, 0.0 }
  0xed   : > { %v698_v36 = vpop.f32.mrf.mxu3 }
  0xee   : > { %v718_v60 = vmax.f32 %v649_v55, 0.0 }
  0xef   : > { %v656_v61 = vpop.f32.mrf.mxu1  ;;  %v599_v63 = vpop.f32.mrf.mxu2 }
  0xf0   : > { %v1180_v62 = vpack.c.bf16 %v718_v60, %v717_v59  ;;  %v600_v1 = vadd.f32 %v1603_v53, %v599_v63 }
  0xf1   : > { %v562_v3 = vpop.f32.mrf.mxu0 }
  0xf2   : > { %1244 = vst [vmem:[%s1614_s11 + $0x18] sm:$0xff] %v1180_v62   ;;  %v689_v4 = vadd.f32 %v688_v43, %v600_v1  ;;  %v563_v7 = vadd.f32 %v1603_v53, %v562_v3 }
  0xf4   : > { %v734_v6 = vmax.f32 %v689_v4, 0.0  ;;  %v652_v13 = vadd.f32 %v651_v37, %v563_v7 }
  0xf6   : > { %v1220_v10 = vpack.c.bf16 %v734_v6, %v733_v5  ;;  %v719_v17 = vmax.f32 %v652_v13, 0.0 }
  0xf7   : > { %v658_v8 = vpop.f32.mrf.mxu1  ;;  %v602_v11 = vpop.f32.mrf.mxu2 }
  0xf8   : > { %1252 = vst [vmem:[%s1614_s11 + $0x58] sm:$0xff] %v1220_v10   ;;  %v603_v16 = vadd.f32 %v1603_v53, %v602_v11  ;;  %v585_v10 = vadd.f32 %v1603_v53, %v1612_v2 }
  0xf9   : > { %v564_v12 = vpop.f32.mrf.mxu0 }
  0xfa   : > { %v565_v14 = vadd.f32 %v1603_v53, %v564_v12  ;;  %v692_v23 = vadd.f32 %v691_v57, %v603_v16 }
  0xfc   : > { %v654_v15 = vadd.f32 %v653_v48, %v565_v14  ;;  %v735_v27 = vmax.f32 %v692_v23, 0.0  ;;  %v701_v48 = vpop.f32.mrf.mxu3 }
  0xfe   : > { %v720_v18 = vmax.f32 %v654_v15, 0.0 }
  0xff   : > { %v661_v19 = vpop.f32.mrf.mxu1  ;;  %v604_v21 = vpop.f32.mrf.mxu2 }
 0x100   : > { %v1185_v20 = vpack.c.bf16 %v720_v18, %v719_v17  ;;  %v605_v24 = vadd.f32 %v1603_v53, %v604_v21 }
 0x101   : > { %v567_v25 = vpop.f32.mrf.mxu0 }
 0x102   : > { %1245 = vst [vmem:[%s1614_s11 + $0x20] sm:$0xff] %v1185_v20   ;;  %v694_v26 = vadd.f32 %v693_v9, %v605_v24  ;;  %v568_v29 = vadd.f32 %v1603_v53, %v567_v25 }
 0x104   : > { %v736_v28 = vmax.f32 %v694_v26, 0.0  ;;  %v657_v34 = vadd.f32 %v656_v61, %v568_v29  ;;  %v703_v0 = vpop.f32.mrf.mxu3 }
 0x106   : > { %v1225_v31 = vpack.c.bf16 %v736_v28, %v735_v27  ;;  %v721_v39 = vmax.f32 %v657_v34, 0.0 }
 0x107   : > { %v663_v30 = vpop.f32.mrf.mxu1  ;;  %v607_v32 = vpop.f32.mrf.mxu2 }
 0x108   : > { %1253 = vst [vmem:[%s1614_s11 + $0x60] sm:$0xff] %v1225_v31   ;;  %v608_v38 = vadd.f32 %v1603_v53, %v607_v32 }
 0x109   : > { %v569_v33 = vpop.f32.mrf.mxu0 }
 0x10a   : > { %v570_v35 = vadd.f32 %v1603_v53, %v569_v33  ;;  %v697_v44 = vadd.f32 %v696_v22, %v608_v38 }
 0x10c   : > { %v659_v37 = vadd.f32 %v658_v8, %v570_v35  ;;  %v737_v49 = vmax.f32 %v697_v44, 0.0  ;;  %v583_v8 = vadd.f32 %v1603_v53, %v1606_v56  ;;  %v706_v18 = vpop.f32.mrf.mxu3 }
 0x10e   : > { %v722_v40 = vmax.f32 %v659_v37, 0.0 }
 0x10f   : > { %v666_v41 = vpop.f32.mrf.mxu1  ;;  %v609_v43 = vpop.f32.mrf.mxu2 }
 0x110   : > { %v1190_v42 = vpack.c.bf16 %v722_v40, %v721_v39  ;;  %v610_v45 = vadd.f32 %v1603_v53, %v609_v43 }
 0x111   : > { %v572_v46 = vpop.f32.mrf.mxu0 }
 0x112   : > { %1246 = vst [vmem:[%s1614_s11 + $0x28] sm:$0xff] %v1190_v42   ;;  %v699_v47 = vadd.f32 %v698_v36, %v610_v45  ;;  %v573_v51 = vadd.f32 %v1603_v53, %v572_v46 }
 0x114   : > { %v738_v50 = vmax.f32 %v699_v47, 0.0  ;;  %v662_v58 = vadd.f32 %v661_v19, %v573_v51  ;;  %v708_v32 = vpop.f32.mrf.mxu3 }
 0x116   : > { %v1230_v54 = vpack.c.bf16 %v738_v50, %v737_v49  ;;  %v723_v62 = vmax.f32 %v662_v58, 0.0 }
 0x117   : > { %v668_v52 = vpop.f32.mrf.mxu1  ;;  %v612_v55 = vpop.f32.mrf.mxu2 }
 0x118   : > { %1254 = vst [vmem:[%s1614_s11 + $0x68] sm:$0xff] %v1230_v54   ;;  %v613_v61 = vadd.f32 %v1603_v53, %v612_v55 }
 0x119   : > { %v574_v57 = vpop.f32.mrf.mxu0 }
 0x11a   : > { %v575_v59 = vadd.f32 %v1603_v53, %v574_v57  ;;  %v702_v5 = vadd.f32 %v701_v48, %v613_v61 }
 0x11c   : > { %v664_v60 = vadd.f32 %v663_v30, %v575_v59  ;;  %v739_v11 = vmax.f32 %v702_v5, 0.0 }
 0x11e   : > { %v724_v63 = vmax.f32 %v664_v60, 0.0 }
 0x11f   : > { %v671_v1 = vpop.f32.mrf.mxu1  ;;  %v614_v4 = vpop.f32.mrf.mxu2 }
 0x120   : > { %v1195_v3 = vpack.c.bf16 %v724_v63, %v723_v62  ;;  %v615_v6 = vadd.f32 %v1603_v53, %v614_v4  ;;  %v672_v12 = vadd.f32 %v671_v1, %v583_v8 }
 0x121   : > { %v577_v7 = vpop.f32.mrf.mxu0 }
 0x122   : > { %1247 = vst [vmem:[%s1614_s11 + $0x30] sm:$0xff] %v1195_v3   ;;  %v704_v9 = vadd.f32 %v703_v0, %v615_v6  ;;  %v578_v14 = vadd.f32 %v1603_v53, %v577_v7  ;;  %v727_v20 = vmax.f32 %v672_v12, 0.0 }
 0x124   : > { %v740_v13 = vmax.f32 %v704_v9, 0.0  ;;  %v667_v22 = vadd.f32 %v666_v41, %v578_v14 }
 0x126   : > { %v1235_v16 = vpack.c.bf16 %v740_v13, %v739_v11  ;;  %v725_v26 = vmax.f32 %v667_v22, 0.0 }
 0x127   : > { %v673_v15 = vpop.f32.mrf.mxu1  ;;  %v617_v19 = vpop.f32.mrf.mxu2 }
 0x128   : > { %v674_v17 = vadd.f32 %v673_v15, %v585_v10  ;;  %1255 = vst [vmem:[%s1614_s11 + $0x70] sm:$0xff] %v1235_v16   ;;  %v618_v25 = vadd.f32 %v1603_v53, %v617_v19 }
 0x129   : > { %v579_v56 = vpop.f32.mrf.mxu0 }
 0x12a   : > { %v728_v21 = vmax.f32 %v674_v17, 0.0  ;;  %v580_v2 = vadd.f32 %v1603_v53, %v579_v56  ;;  %v707_v30 = vadd.f32 %v706_v18, %v618_v25 }
 0x12c   : > { %v1205_v23 = vpack.c.bf16 %v728_v21, %v727_v20  ;;  %v669_v24 = vadd.f32 %v668_v52, %v580_v2  ;;  %v741_v34 = vmax.f32 %v707_v30, 0.0 }
 0x12e   : > { %1249 = vst [vmem:[%s1614_s11 + $0x40] sm:$0xff] %v1205_v23   ;;  %v726_v27 = vmax.f32 %v669_v24, 0.0 }
 0x12f   : > { %v619_v29 = vpop.f32.mrf.mxu2 }
 0x130   : > { %v1200_v28 = vpack.c.bf16 %v726_v27, %v725_v26  ;;  %v620_v31 = vadd.f32 %v1603_v53, %v619_v29 }
 0x132   : > { %1248 = vst [vmem:[%s1614_s11 + $0x38] sm:$0xff] %v1200_v28   ;;  %v709_v33 = vadd.f32 %v708_v32, %v620_v31 }
 0x134   : > { %v742_v35 = vmax.f32 %v709_v33, 0.0 }
 0x136   : > { %v1240_v36 = vpack.c.bf16 %v742_v35, %v741_v34 }
 0x138   : > { %1256 = vst [vmem:[%s1614_s11 + $0x78] sm:$0xff] %v1240_v36  }
 0x139   : > { %1353 = shalt.err (!%p1350_p5)
}
 0x13a   : > { %s1407_s8 = smov 64   ;;  %s1408_s9 = smov 4  }
 0x13b   : > { %1267 = dma.vmem_to_hbm [thread:$0]  (%p1469_p4), %s822_s26, 2048, %s824_s27, %s808_s15, %s1407_s8, %s1407_s8, %s1408_s9  }
 0x13c PF: > { %p1273_p6 = scmp.ge.s32.totalorder %s1404_s17, 2  ;;  %s838_s10 = sand.u32 1, %s1384_s12  }
 0x13d   : > { %s839_s11 = scalar_lea.sflag [#allocation3], %s838_s10 }
 0x13e   : > { %p1270_p7 = pnand %p1273_p6, %p1476_p8 }
 0x140   : > { %p1271_p9 = pneg %p1270_p7 }
 0x142   : > { %1379 = dma.done.wait (%p1271_p9), %s839_s11, 2048  }
 0x143   : > { %1381 = vsyncadd (%p1271_p9), %s839_s11, 4294965248  ;;  %s16_s17 = sadd.s32 1, %s1404_s17   ;;  %s1709_s12 = smov %s1388_s13 }
 0x144   : > { %p13_p10 = scmp.ge.s32.totalorder %s16_s17, 4   ;;  %s1710_s13 = smov %s1392_s14 }
 0x145   : > { %s1711_s14 = smov %s1482_s25  ;;  %s1712_s15 = smov %s1400_s16 }
 0x146   : > { %s1713_s16 = smov %s1715_s20  ;;  %15 = sbr.rel (!%p13_p10) target bundleno = 4 (0x4), region = 73 }
 0x14b   :  { %845 = vsyncpa [#allocation3], 1 }
 0x14c   :  { %847 = vsyncpa [#allocation3 + $0x1], 1 }

</bundles_post_ra>
